<compile_context>
chip_gen: v5e
topology: v5e:2x2
jax: 0.10.0
libtpu: 0.0.40
codegen_flags: <defaults>
</compile_context>

<pallas_src>
import functools

import jax
import jax.numpy as jnp
import numpy as np
from jax.experimental import pallas as pl
from jax.experimental.pallas import tpu as pltpu

_LANE = 128
_SUBLANE = 8


def _round_up(x, m):
    return (x + m - 1) // m * m


def _fused_mlp_kernel(*refs, n_layers):
    """One batch tile of the whole MLP.

    refs = (x_ref, w0, b0, w1, b1, ..., w_{L-1}, b_{L-1}, o_ref)
    Hidden layers: h = relu(h @ W + b).
    Final layer:   y = h @ W_T + b   (W_T pre-transposed in pack_params, no ReLU).
    """
    x_ref = refs[0]
    o_ref = refs[-1]
    wb = refs[1:-1]

    h = x_ref[...]
    for i in range(n_layers - 1):
        w = wb[2 * i][...]
        b = wb[2 * i + 1][...]
        acc = jnp.dot(h, w, preferred_element_type=jnp.float32)  # MXU, f32 acc
        acc = jnp.maximum(acc + b, 0.0)                          # fused bias+ReLU (f32)
        h = acc.astype(w.dtype)

    w = wb[-2][...]   # already transposed to (contract_dim, out_dim) layout
    b = wb[-1][...]
    y = jnp.dot(h, w, preferred_element_type=jnp.float32) + b    # pure vmatmul, no XLU
    o_ref[...] = y.astype(o_ref.dtype)


def init_policy_mlp_params(key, in_features, out_features, hidden_sizes):
    """Mirrors TritonPolicyMLP.__init__: orthogonal weights (gain 2.0 for hidden
    layers, 0.01 for the last), zero biases; weights stored (in, out)."""
    layer_sizes = [in_features] + list(hidden_sizes) + [out_features]
    params = []
    n_layers = len(layer_sizes) - 1
    for i in range(n_layers):
        key, sub = jax.random.split(key)
        gain = 2.0 if i < n_layers - 1 else 0.01
        w = jax.nn.initializers.orthogonal(scale=gain)(
            sub, (layer_sizes[i], layer_sizes[i + 1]), jnp.float32)
        b = jnp.zeros((layer_sizes[i + 1],), jnp.float32)
        params.append((w, b))
    return params


def pack_params(params, *, compute_dtype=jnp.float32):
    """One-time layout prep (NOT per forward):
      * final-layer weight is transposed once so the kernel does a plain
        (M,K)x(K,N) matmul for F.linear(x, W, b) = x @ W.T + b;
      * output (lane) dims are zero-padded to multiples of 128 (lane-dense);
      * the FIRST layer's contraction dim is padded only to the sublane (8),
        so x does not have to be 128-padded in HBM; deeper contraction dims
        are 128-padded to match the previous layer's lane-padded output;
      * weights are cast to compute_dtype (use bfloat16 on v6e/v7x for large
        sizes); biases stay f32 for the f32 accumulator epilogue.
    """
    n_layers = len(params)
    w_last = params[-1][0]
    # The PyTorch module's final F.linear(x, W, b) with W stored
    # (hidden_last, out_features) only type-checks when out_features ==
    # hidden_sizes[-1]; enforce it here instead of hiding it behind padding.
    assert w_last.shape[0] == w_last.shape[1], (
        "TritonPolicyMLP's final F.linear requires out_features == "
        f"hidden_sizes[-1]; got last weight shape {w_last.shape}")

    packed = []
    for i, (w, b) in enumerate(params):
        if i == n_layers - 1:
            w = w.T  # pre-transpose once (host/XLA op), kernel sees MXU-native layout
        k, n = w.shape
        k_pad = _round_up(k, _SUBLANE if i == 0 else _LANE)
        n_pad = _round_up(n, _LANE)
        wp = jnp.zeros((k_pad, n_pad), compute_dtype).at[:k, :n].set(
            w.astype(compute_dtype))
        bp = jnp.zeros((1, n_pad), jnp.float32).at[:, :b.shape[0]].set(
            b.astype(jnp.float32))
        packed.append((wp, bp))
    return packed


def _choose_tile_m(M, block_m, sublane_mult):
    """Largest batch tile <= block_m, rounded to the dtype's sublane packing.
    If the whole batch would fit in one tile but there is enough work, split
    into 2 tiles so dimension_semantics=("parallel",) can use both v7x TCs
    (on single-TC v5e/v6e this only costs ~0.35 us of extra step overhead)."""
    tm = min(block_m, _round_up(M, sublane_mult))
    tm = _round_up(tm, sublane_mult)
    if _round_up(M, tm) // tm < 2 and M >= 2 * sublane_mult:
        tm = _round_up((M + 1) // 2, sublane_mult)
    return tm


def triton_policy_mlp_forward(x, packed_params, out_features, *,
                              block_m=256, weight_buffer_count=None):
    """Fused forward pass matching TritonPolicyMLP.forward.

    x: (batch, in_features); packed_params from pack_params(); returns
    (batch, out_features) in x.dtype.  weight_buffer_count=1 halves the
    resident-weight VMEM footprint (recommended on v7x for large hidden sizes);
    None keeps Pallas' default double-buffering.
    """
    M, K = x.shape
    n_layers = len(packed_params)
    compute_dtype = packed_params[0][0].dtype
    itemsize = compute_dtype.itemsize
    out_itemsize = jnp.dtype(x.dtype).itemsize
    k_in = packed_params[0][0].shape[0]        # first-layer contraction dim (sublane-padded K)
    n_out_pad = packed_params[-1][0].shape[1]  # lane-padded output width
    assert K <= k_in

    # Sublane packing: 8 rows for 4-byte, 16 for bf16, 32 for int8/fp8.
    sublane_mult = _SUBLANE * (4 // itemsize)
    tm = _choose_tile_m(M, block_m, sublane_mult)
    m_pad = _round_up(M, tm)

    # Only pad what actually needs padding: batch rows up to the tile boundary
    # and (rarely) K up to a sublane multiple.  No 128-wide K padding in HBM.
    if m_pad != M or k_in != K or x.dtype != compute_dtype:
        x_in = jnp.zeros((m_pad, k_in), compute_dtype).at[:M, :K].set(
            x.astype(compute_dtype))
    else:
        x_in = x

    weight_spec_kwargs = {}
    if weight_buffer_count is not None:
        # Resident weights/biases never change across the batch grid, so a
        # single buffer is enough (halves their VMEM footprint on v7x).
        weight_spec_kwargs = dict(pipeline_mode=pl.Buffered(weight_buffer_count))

    flat_params = []
    in_specs = [pl.BlockSpec((tm, k_in), lambda i: (i, 0))]       # X batch tile
    for w, b in packed_params:
        flat_params += [w, b]
        in_specs.append(pl.BlockSpec(w.shape, lambda i: (0, 0), **weight_spec_kwargs))
        in_specs.append(pl.BlockSpec(b.shape, lambda i: (0, 0), **weight_spec_kwargs))

    # Advisory cost estimate (what the kernel actually moves/computes) so XLA
    # can schedule the surrounding pad/cast/slice ops around the custom call.
    param_bytes = sum(int(w.size) * w.dtype.itemsize + int(b.size) * b.dtype.itemsize
                      for w, b in packed_params)
    flops = 2 * m_pad * sum(int(w.shape[0]) * int(w.shape[1]) for w, _ in packed_params)
    bytes_accessed = (int(x_in.size) * x_in.dtype.itemsize
                      + param_bytes
                      + m_pad * n_out_pad * out_itemsize)
    cost = pl.CostEstimate(flops=flops, transcendentals=0,
                           bytes_accessed=bytes_accessed)

    # Raise the scoped-VMEM limit only when the resident weights need it
    # (v5e defaults to 16 MiB scoped); stay well under v7x's 64 MiB physical.
    wbufs = 2 if weight_buffer_count is None else weight_buffer_count
    max_width = max(int(w.shape[1]) for w, _ in packed_params)
    est_vmem = (wbufs * param_bytes
                + 2 * tm * (k_in * itemsize + n_out_pad * out_itemsize)
                + 2 * tm * max_width * 4
                + (2 << 20))
    compiler_kwargs = dict(dimension_semantics=("parallel",))   # batch tiles shard across TCs
    if est_vmem > (16 << 20):
        compiler_kwargs["vmem_limit_bytes"] = int(min(est_vmem, 60 << 20))

    kernel = functools.partial(_fused_mlp_kernel, n_layers=n_layers)
    y_pad = pl.pallas_call(
        kernel,
        out_shape=jax.ShapeDtypeStruct((m_pad, n_out_pad), x.dtype),
        grid_spec=pltpu.PrefetchScalarGridSpec(
            num_scalar_prefetch=0,
            grid=(m_pad // tm,),
            in_specs=in_specs,
            out_specs=pl.BlockSpec((tm, n_out_pad), lambda i: (i, 0)),
        ),
        compiler_params=pltpu.CompilerParams(**compiler_kwargs),
        cost_estimate=cost,
    )(x_in, *flat_params)

    return y_pad[:M, :out_features]


def _reference_forward(x, params):
    for w, b in params[:-1]:
        x = jnp.maximum(x @ w + b, 0.0)
    w_last, b_last = params[-1]
    return x @ w_last.T + b_last


if __name__ == "__main__":
    key = jax.random.PRNGKey(0)

    batch = 200          # not a tile multiple -> exercises batch padding + 2-step grid
    in_features = 16
    hidden_sizes = [32, 32]
    out_features = 32    # F.linear in the reference module requires == hidden_sizes[-1]

    k_params, k_x = jax.random.split(key)
    params = init_policy_mlp_params(k_params, in_features, out_features, hidden_sizes)
    packed = pack_params(params)   # one-time padding / transpose / layout prep
    x = jax.random.normal(k_x, (batch, in_features), jnp.float32)

    y = triton_policy_mlp_forward(x, packed, out_features)
    y = jax.block_until_ready(y)

    y_ref = _reference_forward(x, params)
    np.testing.assert_allclose(np.asarray(y), np.asarray(y_ref), rtol=1e-5, atol=2e-5)

    print("KERNEL_OK")
</pallas_src>

<mosaic_0001>
module attributes {stable_mosaic.version = 11 : i64} {
  func.func @_fused_mlp_kernel(%arg0: i32, %arg1: memref<104x16xf32, #tpu.memory_space<vmem>>, %arg2: memref<16x128xf32, #tpu.memory_space<vmem>>, %arg3: memref<1x128xf32, #tpu.memory_space<vmem>>, %arg4: memref<128x128xf32, #tpu.memory_space<vmem>>, %arg5: memref<1x128xf32, #tpu.memory_space<vmem>>, %arg6: memref<128x128xf32, #tpu.memory_space<vmem>>, %arg7: memref<1x128xf32, #tpu.memory_space<vmem>>, %arg8: memref<104x128xf32, #tpu.memory_space<vmem>>) attributes {dimension_semantics = [#tpu.dimension_semantics<parallel>], iteration_bounds = array<i64: 2>, scalar_prefetch = 0 : i64, scratch_operands = 0 : i64, tpu.core_type = #tpu.core_type<tc>, window_params = [{transform_indices = @transform_0, window_bounds = array<i64: 104, 16>}, {pipeline_mode = #tpu.pipeline_mode<synchronous>, transform_indices = @transform_1, window_bounds = array<i64: 16, 128>}, {pipeline_mode = #tpu.pipeline_mode<synchronous>, transform_indices = @transform_2, window_bounds = array<i64: 1, 128>}, {pipeline_mode = #tpu.pipeline_mode<synchronous>, transform_indices = @transform_3, window_bounds = array<i64: 128, 128>}, {pipeline_mode = #tpu.pipeline_mode<synchronous>, transform_indices = @transform_4, window_bounds = array<i64: 1, 128>}, {pipeline_mode = #tpu.pipeline_mode<synchronous>, transform_indices = @transform_5, window_bounds = array<i64: 128, 128>}, {pipeline_mode = #tpu.pipeline_mode<synchronous>, transform_indices = @transform_6, window_bounds = array<i64: 1, 128>}, {transform_indices = @transform_7, window_bounds = array<i64: 104, 128>}]} {
    %c0 = arith.constant 0 : index
    %c0_0 = arith.constant 0 : index
    %0 = vector.load %arg1[%c0, %c0_0] : memref<104x16xf32, #tpu.memory_space<vmem>>, vector<104x16xf32>
    %c0_1 = arith.constant 0 : index
    %c0_2 = arith.constant 0 : index
    %1 = vector.load %arg2[%c0_1, %c0_2] : memref<16x128xf32, #tpu.memory_space<vmem>>, vector<16x128xf32>
    %c0_3 = arith.constant 0 : index
    %c0_4 = arith.constant 0 : index
    %2 = vector.load %arg3[%c0_3, %c0_4] : memref<1x128xf32, #tpu.memory_space<vmem>>, vector<1x128xf32>
    %cst = arith.constant dense<0.000000e+00> : vector<104x128xf32>
    %3 = tpu.matmul %0, %1, %cst {dimension_numbers = #tpu.dot_dimension_numbers<[1], [0], [0], [1], [0, 0, 1, 1], [], []>} : vector<104x16xf32>, vector<16x128xf32>, vector<104x128xf32> -> vector<104x128xf32>
    %4 = vector.broadcast %2 : vector<1x128xf32> to vector<104x128xf32>
    %5 = arith.addf %3, %4 : vector<104x128xf32>
    %cst_5 = arith.constant 0.000000e+00 : f32
    %6 = vector.broadcast %cst_5 : f32 to vector<104x128xf32>
    %7 = arith.maximumf %5, %6 : vector<104x128xf32>
    %c0_6 = arith.constant 0 : index
    %c0_7 = arith.constant 0 : index
    %8 = vector.load %arg4[%c0_6, %c0_7] : memref<128x128xf32, #tpu.memory_space<vmem>>, vector<128x128xf32>
    %c0_8 = arith.constant 0 : index
    %c0_9 = arith.constant 0 : index
    %9 = vector.load %arg5[%c0_8, %c0_9] : memref<1x128xf32, #tpu.memory_space<vmem>>, vector<1x128xf32>
    %cst_10 = arith.constant dense<0.000000e+00> : vector<104x128xf32>
    %10 = tpu.matmul %7, %8, %cst_10 {dimension_numbers = #tpu.dot_dimension_numbers<[1], [0], [0], [1], [0, 0, 1, 1], [], []>} : vector<104x128xf32>, vector<128x128xf32>, vector<104x128xf32> -> vector<104x128xf32>
    %11 = vector.broadcast %9 : vector<1x128xf32> to vector<104x128xf32>
    %12 = arith.addf %10, %11 : vector<104x128xf32>
    %cst_11 = arith.constant 0.000000e+00 : f32
    %13 = vector.broadcast %cst_11 : f32 to vector<104x128xf32>
    %14 = arith.maximumf %12, %13 : vector<104x128xf32>
    %c0_12 = arith.constant 0 : index
    %c0_13 = arith.constant 0 : index
    %15 = vector.load %arg6[%c0_12, %c0_13] : memref<128x128xf32, #tpu.memory_space<vmem>>, vector<128x128xf32>
    %c0_14 = arith.constant 0 : index
    %c0_15 = arith.constant 0 : index
    %16 = vector.load %arg7[%c0_14, %c0_15] : memref<1x128xf32, #tpu.memory_space<vmem>>, vector<1x128xf32>
    %cst_16 = arith.constant dense<0.000000e+00> : vector<104x128xf32>
    %17 = tpu.matmul %14, %15, %cst_16 {dimension_numbers = #tpu.dot_dimension_numbers<[1], [0], [0], [1], [0, 0, 1, 1], [], []>} : vector<104x128xf32>, vector<128x128xf32>, vector<104x128xf32> -> vector<104x128xf32>
    %18 = vector.broadcast %16 : vector<1x128xf32> to vector<104x128xf32>
    %19 = arith.addf %17, %18 : vector<104x128xf32>
    %c0_17 = arith.constant 0 : index
    %c0_18 = arith.constant 0 : index
    %20 = vector.load %arg8[%c0_17, %c0_18] : memref<104x128xf32, #tpu.memory_space<vmem>>, vector<104x128xf32>
    tpu.vector_store %arg8[%c0_17, %c0_18], %19 {strides = array<i32>} : memref<104x128xf32, #tpu.memory_space<vmem>>, vector<104x128xf32>,
    return
  }
  func.func @transform_0(%arg0: i32) -> (i32, i32) {
    %c0_i32 = arith.constant 0 : i32
    %c0_i32_0 = arith.constant 0 : i32
    return %arg0, %c0_i32 : i32, i32
  }
  func.func @transform_1(%arg0: i32) -> (i32, i32) {
    %c0_i32 = arith.constant 0 : i32
    %c0_i32_0 = arith.constant 0 : i32
    %c0_i32_1 = arith.constant 0 : i32
    return %c0_i32, %c0_i32_0 : i32, i32
  }
  func.func @transform_2(%arg0: i32) -> (i32, i32) {
    %c0_i32 = arith.constant 0 : i32
    %c0_i32_0 = arith.constant 0 : i32
    %c0_i32_1 = arith.constant 0 : i32
    return %c0_i32, %c0_i32_0 : i32, i32
  }
  func.func @transform_3(%arg0: i32) -> (i32, i32) {
    %c0_i32 = arith.constant 0 : i32
    %c0_i32_0 = arith.constant 0 : i32
    %c0_i32_1 = arith.constant 0 : i32
    return %c0_i32, %c0_i32_0 : i32, i32
  }
  func.func @transform_4(%arg0: i32) -> (i32, i32) {
    %c0_i32 = arith.constant 0 : i32
    %c0_i32_0 = arith.constant 0 : i32
    %c0_i32_1 = arith.constant 0 : i32
    return %c0_i32, %c0_i32_0 : i32, i32
  }
  func.func @transform_5(%arg0: i32) -> (i32, i32) {
    %c0_i32 = arith.constant 0 : i32
    %c0_i32_0 = arith.constant 0 : i32
    %c0_i32_1 = arith.constant 0 : i32
    return %c0_i32, %c0_i32_0 : i32, i32
  }
  func.func @transform_6(%arg0: i32) -> (i32, i32) {
    %c0_i32 = arith.constant 0 : i32
    %c0_i32_0 = arith.constant 0 : i32
    %c0_i32_1 = arith.constant 0 : i32
    return %c0_i32, %c0_i32_0 : i32, i32
  }
  func.func @transform_7(%arg0: i32) -> (i32, i32) {
    %c0_i32 = arith.constant 0 : i32
    %c0_i32_0 = arith.constant 0 : i32
    return %arg0, %c0_i32 : i32, i32
  }
}

</mosaic_0001>

<bundles_post_ra>
// kernel: tpu_custom_call.1
= control target key start
LH: loop header
LB: loop body
LE: loop exit
PB: predicated region body
PF: predicated region fallthrough
CT: control target
= control target key end

     0   :  { %12 = vsyncpa [#allocation3], 0  ;;  %s1170_s0 = inlined_call_operand.vmem [shape: f32[208,16], index: 0, kind: input, shape index: {}]   ;;  %s1171_s1 = inlined_call_operand.vmem [shape: f32[16,128], index: 1, kind: input, shape index: {}]   ;;  %s1172_s2 = inlined_call_operand.vmem [shape: f32[1,128], index: 2, kind: input, shape index: {}]   ;;  %s1173_s3 = inlined_call_operand.vmem [shape: f32[128,128], index: 3, kind: input, shape index: {}]   ;;  %s1174_s4 = inlined_call_operand.vmem [shape: f32[1,128], index: 4, kind: input, shape index: {}]   ;;  %s1175_s5 = inlined_call_operand.hbm [shape: f32[128,128], index: 5, kind: input, shape index: {}]   ;;  %s1176_s6 = inlined_call_operand.vmem [shape: f32[1,128], index: 6, kind: input, shape index: {}]   ;;  %s1177_s7 = inlined_call_operand.hbm [shape: f32[208,128], index: 7, kind: output, shape index: {}]  }
   0x1   :  { %13 = vsyncpa [#allocation4], 0 }
   0x2   :  { %15 = vsyncpa [#allocation4 + $0x1], 0  ;;  %s950_s24 = smov 0   ;;  %s952_s25 = smov 0  }
   0x3   :  { %s954_s26 = smov 0   ;;  %s956_s27 = smov 0  }
   0x4 LB: > { %s971_s28 = sadd.s32 4294967295, %s903_s27   ;;  %s693_s29 = sadd.s32 4294967294, %s903_s27   ;;  %s903_s27 = sphi %s956_s27, %s1183_s27   ;;  %s899_s26 = sphi %s954_s26, %s1182_s26   ;;  %s895_s25 = sphi %s952_s25, %s1181_s25   ;;  %s891_s24 = sphi %s950_s24, %s1180_s24  }
   0x5   : > { %s975_s30 = sadd.s32 1, %s903_s27   ;;  %s180_s8 = sadd.s32 1, %s899_s26 }
   0x6   : > { %s177_s9 = ssub.s32 %s903_s27, %s975_s30  ;;  %p190_p0 = scmp.ne.s32.totalorder %s899_s26, %s895_s25 }
   0x7   : > { %p178_p1 = scmp.eq.s32.totalorder %s177_s9, 0  ;;  %p191_p2 = scmp.eq.s32.totalorder %s971_s28, 1 }
   0x8   : > { %p196_p3 = scmp.ne.s32.totalorder %s895_s25, %s891_s24  ;;  %p197_p4 = scmp.eq.s32.totalorder %s693_s29, 1 }
   0x9   : > { %s986_s10 = scalar_select %p178_p1, %s899_s26, %s180_s8  }
   0xa   : > { %p988_p5 = por %p191_p2, %p190_p0  ;;  %p992_p6 = por %p197_p4, %p196_p3 }
   0xb   : > { %p694_p7 = scmp.ge.s32.totalorder %s903_s27, 1  ;;  %p204_p8 = scmp.lt.s32.totalorder %s903_s27, 3 }
   0xc   : > { %p764_p9 = scmp.eq.s32.totalorder %s971_s28, 0  ;;  %s227_s15 = sshll.u32 %s1175_s5, 4  ;;  %s228_s15 = int_to_ptr.hbm [resolvable:$true] %s227_s15 }
   0xd   : > { %p205_p10 = pnand %p694_p7, %p204_p8  ;;  %s905_s16 = smov [#allocation2]  }
   0xe   : > { %s229_s17 = sshll.u32 %s905_s16, 4  ;;  %s906_s18 = smov 128   ;;  %s230_s17 = int_to_ptr.vmem [resolvable:$true] %s229_s17 }
   0xf   : > { %p756_p11 = pneg %p205_p10  ;;  %s907_s19 = smov 8  }
  0x10   : > { %257 = sbr.rel (%p205_p10) target bundleno = 530 (0x212), region = 48 }
  0x11   : > { %p757_p12 = pnand %p764_p9, %p756_p11 }
  0x13   : > { %759 = dma.hbm_to_vmem [thread:$0]  (!%p757_p12), %s228_s15, 2048, %s230_s17, [#allocation3], %s906_s18, %s906_s18, %s907_s19  }
  0x15   : > { %882 = dma.done.wait (%p764_p9), [#allocation3], 2048  }
  0x16   : > { %884 = vsyncadd (%p764_p9), [#allocation3], 4294965248  ;;  %s290_s20 = smul.u32 13, %s971_s28  ;;  %v311_v0 = vld [vmem:[%s1171_s1 + $0x8] sm:$0xff]  ;;  %v310_v1 = vld [vmem:[%s1171_s1] sm:$0xff]  ;;  %vm316_vm0 = vcmask 130048  }
  0x17   : > { %370 = vmatpush.msra.mxu0 %v311_v0  ;;  %v440_v11 = vld [vmem:[%s1173_s3 + $0x78] sm:$0xff]  ;;  %v439_v12 = vld [vmem:[%s1173_s3 + $0x70] sm:$0xff]  ;;  %v438_v13 = vld [vmem:[%s1173_s3 + $0x68] sm:$0xff]  ;;  %s287_s29 = sand.u32 1, %s895_s25   ;;  %s716_s16 = smul.u32 104, %s971_s28 }
  0x18   : > { %p291_p13 = scmp.lt.s32.totalorder %s290_s20, 25  ;;  %445 = vmatpush.msra.mxu1 %v440_v11  ;;  %717 = vmatpush.msra.mxu3 %v440_v11  ;;  %v437_v14 = vld [vmem:[%s1173_s3 + $0x60] sm:$0xff]  ;;  %v436_v16 = vld [vmem:[%s1173_s3 + $0x58] sm:$0xff]  ;;  %v435_v17 = vld [vmem:[%s1173_s3 + $0x50] sm:$0xff]  ;;  %s749_s8 = smul.u32 104, %s287_s29 }
  0x19   : > { %371 = vmatpush.msra.mxu0 %v310_v1  ;;  %v434_v18 = vld [vmem:[%s1173_s3 + $0x48] sm:$0xff]  ;;  %v433_v19 = vld [vmem:[%s1173_s3 + $0x40] sm:$0xff]  ;;  %v432_v21 = vld [vmem:[%s1173_s3 + $0x38] sm:$0xff]  ;;  %s615_s19 = scalar_lea.hbm %s1177_s7, %s716_s16  ;;  %s604_s22 = scalar_lea.sflag [#allocation4], %s287_s29 }
  0x1a   : > { %s1185_s20 = smov (!%p291_p13, %s290_s20), 25  ;;  %446 = vmatpush.msra.mxu1 %v439_v12  ;;  %718 = vmatpush.msra.mxu3 %v439_v12  ;;  %v431_v22 = vld [vmem:[%s1173_s3 + $0x30] sm:$0xff]  ;;  %v430_v23 = vld [vmem:[%s1173_s3 + $0x28] sm:$0xff]  ;;  %v429_v24 = vld [vmem:[%s1173_s3 + $0x20] sm:$0xff]  ;;  %s1121_s15 = scalar_lea.vmem [#allocation5], %s749_s8 }
  0x1b   : > { %s699_s21 = sshll.u32 %s1185_s20, 3  ;;  %v428_v26 = vld [vmem:[%s1173_s3 + $0x18] sm:$0xff]  ;;  %v427_v27 = vld [vmem:[%s1173_s3 + $0x10] sm:$0xff]  ;;  %v426_v29 = vld [vmem:[%s1173_s3 + $0x8] sm:$0xff]  ;;  %s616_s20 = sshll.u32 %s1121_s15, 4  ;;  %s617_s20 = int_to_ptr.vmem [resolvable:$true] %s616_s20 }
  0x1c   : > { %s1018_s14 = scalar_lea.vmem %s1170_s0, %s699_s21  ;;  %447 = vmatpush.msra.mxu1 %v438_v13  ;;  %719 = vmatpush.msra.mxu3 %v438_v13  ;;  %v425_v30 = vld [vmem:[%s1173_s3] sm:$0xff]  ;;  %v529_v59 = vld [vmem:[#allocation2 + $0x78] sm:$0xff]  ;;  %v528_v60 = vld [vmem:[#allocation2 + $0x70] sm:$0xff]  ;;  %s618_s21 = sshll.u32 %s615_s19, 4  ;;  %s619_s21 = int_to_ptr.hbm [resolvable:$true] %s618_s21 }
  0x1d   : > { %v297_v2 = vld [vmem:[%s1018_s14] sm:$0xff]  ;;  %v298_v3 = vld [vmem:[%s1018_s14 + $0x8] sm:$0xff]  ;;  %v299_v4 = vld [vmem:[%s1018_s14 + $0x10] sm:$0xff]  ;;  %534 = vmatpush.msra.mxu2 %v529_v59  ;;  %s857_s9 = scalar_lea.hbm %s1177_s7, 208 }
  0x1e   : > { %700 = vmatmul.msk.f32.vlgmr.msra.gmra.mxu0 %vm316_vm0, %v297_v2  ;;  %v300_v5 = vld [vmem:[%s1018_s14 + $0x18] sm:$0xff]  ;;  %v301_v6 = vld [vmem:[%s1018_s14 + $0x20] sm:$0xff]  ;;  %v302_v7 = vld [vmem:[%s1018_s14 + $0x28] sm:$0xff]  ;;  %448 = vmatpush.msra.mxu1 %v437_v14 }
  0x1f   : > { %v303_v8 = vld [vmem:[%s1018_s14 + $0x30] sm:$0xff]  ;;  %v304_v9 = vld [vmem:[%s1018_s14 + $0x38] sm:$0xff]  ;;  %v305_v10 = vld [vmem:[%s1018_s14 + $0x40] sm:$0xff]  ;;  %720 = vmatpush.msra.mxu3 %v437_v14  ;;  %535 = vmatpush.msra.mxu2 %v528_v60 }
  0x20   : > { %v306_v15 = vld [vmem:[%s1018_s14 + $0x48] sm:$0xff]  ;;  %449 = vmatpush.msra.mxu1 %v436_v16  ;;  %v307_v20 = vld [vmem:[%s1018_s14 + $0x50] sm:$0xff]  ;;  %v308_v25 = vld [vmem:[%s1018_s14 + $0x58] sm:$0xff] }
  0x21   : > { %721 = vmatpush.msra.mxu3 %v436_v16  ;;  %v309_v28 = vld [vmem:[%s1018_s14 + $0x60] sm:$0xff]  ;;  %v527_v61 = vld [vmem:[#allocation2 + $0x68] sm:$0xff]  ;;  %v525_v2 = vld [vmem:[#allocation2 + $0x58] sm:$0xff]  ;;  %s851_s14 = sshra.s32 %s619_s21, 4  ;;  %s852_s14 = int_to_ptr.hbm [resolvable:$true] %s851_s14 }
  0x22   : > { %450 = vmatpush.msra.mxu1 %v435_v17  ;;  %v1097_v31 = vld [vmem:[%s1172_s2] ss:$0 sm:$0xff]  ;;  %536 = vmatpush.msra.mxu2 %v527_v61  ;;  %v519_v11 = vld [vmem:[#allocation2 + $0x28] sm:$0xff]  ;;  %v517_v16 = vld [vmem:[#allocation2 + $0x18] sm:$0xff]  ;;  %s853_s28 = scalar_lea.hbm %s852_s14, 104  ;;  %p858_p3 = scmp.lt.s32.totalorder %s852_s14, %s1177_s7 }
  0x23   : > { %722 = vmatpush.msra.mxu3 %v435_v17  ;;  %v526_v0 = vld [vmem:[#allocation2 + $0x60] sm:$0xff]  ;;  %p854_p0 = scmp.ne.s32.totalorder %s852_s14, %s853_s28  ;;  %p859_p4 = scmp.lt.s32.totalorder %s857_s9, %s853_s28 }
  0x24   : > { %451 = vmatpush.msra.mxu1 %v434_v18  ;;  %537 = vmatpush.msra.mxu2 %v526_v0  ;;  %v518_v14 = vld [vmem:[#allocation2 + $0x20] sm:$0xff] }
  0x25   : > { %723 = vmatpush.msra.mxu3 %v434_v18  ;;  %p855_p1 = pnand %p854_p0, %p988_p5  ;;  %p860_p7 = por %p859_p4, %p858_p3 }
  0x26   : > { %701 = vmatmul.msk.f32.gmra.mxu0 %vm316_vm0, %v298_v3  ;;  %452 = vmatpush.msra.mxu1 %v433_v19  ;;  %v524_v3 = vld [vmem:[#allocation2 + $0x50] sm:$0xff] }
  0x27   : > { %724 = vmatpush.msra.mxu3 %v433_v19  ;;  %538 = vmatpush.msra.mxu2 %v525_v2  ;;  %v516_v19 = vld [vmem:[#allocation2 + $0x10] sm:$0xff]  ;;  %p856_p2 = pneg %p855_p1 }
  0x28   : > { %453 = vmatpush.msra.mxu1 %v432_v21 }
  0x29   : > { %725 = vmatpush.msra.mxu3 %v432_v21  ;;  %539 = vmatpush.msra.mxu2 %v524_v3  ;;  %v515_v21 = vld [vmem:[#allocation2 + $0x8] sm:$0xff]  ;;  %p861_p8 = pnand %p860_p7, %p856_p2 }
  0x2a   : > { %454 = vmatpush.msra.mxu1 %v431_v22 }
  0x2b   : > { %726 = vmatpush.msra.mxu3 %v431_v22  ;;  %v514_v22 = vld [vmem:[#allocation2] sm:$0xff] }
  0x2c   : > { %455 = vmatpush.msra.mxu1 %v430_v23 }
  0x2d   : > { %727 = vmatpush.msra.mxu3 %v430_v23  ;;  %v805_v23 = vld [vmem:[%s1174_s4] ss:$0 sm:$0xff] }
  0x2e   : > { %702 = vmatmul.msk.f32.gmra.mxu0 %vm316_vm0, %v299_v4  ;;  %456 = vmatpush.msra.mxu1 %v429_v24  ;;  %v523_v4 = vld [vmem:[#allocation2 + $0x48] sm:$0xff] }
  0x2f   : > { %728 = vmatpush.msra.mxu3 %v429_v24  ;;  %540 = vmatpush.msra.mxu2 %v523_v4 }
  0x30   : > { %457 = vmatpush.msra.mxu1 %v428_v26 }
  0x31   : > { %729 = vmatpush.msra.mxu3 %v428_v26 }
  0x32   : > { %458 = vmatpush.msra.mxu1 %v427_v27 }
  0x33   : > { %730 = vmatpush.msra.mxu3 %v427_v27 }
  0x34   : > { %459 = vmatpush.msra.mxu1 %v426_v29 }
  0x35   : > { %731 = vmatpush.msra.mxu3 %v426_v29 }
  0x36   : > { %703 = vmatmul.msk.f32.gmra.mxu0 %vm316_vm0, %v300_v5  ;;  %460 = vmatpush.msra.mxu1 %v425_v30 }
  0x37   : > { %732 = vmatpush.msra.mxu3 %v425_v30 }
  0x39   : > { %733 = vmatpush.msrb.mxu3 %v529_v59 }
  0x3b   : > { %734 = vmatpush.msrb.mxu3 %v528_v60 }
  0x3d   : > { %735 = vmatpush.msrb.mxu3 %v527_v61 }
  0x3e   : > { %704 = vmatmul.msk.f32.gmra.mxu0 %vm316_vm0, %v301_v6 }
  0x3f   : > { %736 = vmatpush.msrb.mxu3 %v526_v0 }
  0x41   : > { %737 = vmatpush.msrb.mxu3 %v525_v2 }
  0x43   : > { %738 = vmatpush.msrb.mxu3 %v524_v3 }
  0x45   : > { %739 = vmatpush.msrb.mxu3 %v523_v4 }
  0x46   : > { %705 = vmatmul.msk.f32.gmra.mxu0 %vm316_vm0, %v302_v7  ;;  %v522_v7 = vld [vmem:[#allocation2 + $0x40] sm:$0xff] }
  0x47   : > { %541 = vmatpush.msra.mxu2 %v522_v7  ;;  %740 = vmatpush.msrb.mxu3 %v522_v7 }
  0x4e   : > { %706 = vmatmul.msk.f32.gmra.mxu0 %vm316_vm0, %v303_v8 }
  0x56   : > { %707 = vmatmul.msk.f32.gmra.mxu0 %vm316_vm0, %v304_v9  ;;  %v521_v9 = vld [vmem:[#allocation2 + $0x38] sm:$0xff] }
  0x57   : > { %542 = vmatpush.msra.mxu2 %v521_v9  ;;  %741 = vmatpush.msrb.mxu3 %v521_v9 }
  0x5e   : > { %708 = vmatmul.msk.f32.gmra.mxu0 %vm316_vm0, %v305_v10  ;;  %v520_v10 = vld [vmem:[#allocation2 + $0x30] sm:$0xff] }
  0x5f   : > { %543 = vmatpush.msra.mxu2 %v520_v10  ;;  %742 = vmatpush.msrb.mxu3 %v520_v10 }
  0x61   : > { %544 = vmatpush.msra.mxu2 %v519_v11  ;;  %743 = vmatpush.msrb.mxu3 %v519_v11 }
  0x63   : > { %545 = vmatpush.msra.mxu2 %v518_v14  ;;  %744 = vmatpush.msrb.mxu3 %v518_v14 }
  0x65   : > { %546 = vmatpush.msra.mxu2 %v517_v16  ;;  %745 = vmatpush.msrb.mxu3 %v517_v16 }
  0x66   : > { %709 = vmatmul.msk.f32.gmra.mxu0 %vm316_vm0, %v306_v15 }
  0x67   : > { %547 = vmatpush.msra.mxu2 %v516_v19  ;;  %746 = vmatpush.msrb.mxu3 %v516_v19 }
  0x69   : > { %548 = vmatpush.msra.mxu2 %v515_v21  ;;  %747 = vmatpush.msrb.mxu3 %v515_v21 }
  0x6b   : > { %549 = vmatpush.msra.mxu2 %v514_v22  ;;  %748 = vmatpush.msrb.mxu3 %v514_v22 }
  0x6e   : > { %710 = vmatmul.msk.f32.gmra.mxu0 %vm316_vm0, %v307_v20 }
  0x76   : > { %711 = vmatmul.msk.f32.gmra.mxu0 %vm316_vm0, %v308_v25 }
  0x7e   : > { %712 = vmatmul.msk.f32.gmra.mxu0 %vm316_vm0, %v309_v28 }
  0x9b   : > { %v373_v32 = vpop.f32.mrf.mxu0 }
  0x9c   : > { %v374_v33 = vadd.f32 %v1097_v31, %v373_v32 }
  0x9e   : > { %v412_v34 = vmax.f32 %v374_v33, 0.0 }
  0xa0   : > { %461 = vmatmul.f32.vlgmr.msra.gmra.mxu1 %v412_v34 }
  0xa3   : > { %v376_v35 = vpop.f32.mrf.mxu0 }
  0xa4   : > { %v377_v36 = vadd.f32 %v1097_v31, %v376_v35 }
  0xa6   : > { %v413_v37 = vmax.f32 %v377_v36, 0.0 }
  0xa8   : > { %464 = vmatmul.f32.gmra.mxu1 %v413_v37 }
  0xab   : > { %v379_v38 = vpop.f32.mrf.mxu0 }
  0xac   : > { %v380_v39 = vadd.f32 %v1097_v31, %v379_v38 }
  0xae   : > { %v414_v40 = vmax.f32 %v380_v39, 0.0 }
  0xb0   : > { %467 = vmatmul.f32.gmra.mxu1 %v414_v40 }
  0xb3   : > { %v382_v41 = vpop.f32.mrf.mxu0 }
  0xb4   : > { %v383_v42 = vadd.f32 %v1097_v31, %v382_v41 }
  0xb6   : > { %v415_v43 = vmax.f32 %v383_v42, 0.0 }
  0xb8   : > { %470 = vmatmul.f32.gmra.mxu1 %v415_v43 }
  0xbb   : > { %v385_v44 = vpop.f32.mrf.mxu0 }
  0xbc   : > { %v386_v45 = vadd.f32 %v1097_v31, %v385_v44 }
  0xbe   : > { %v416_v46 = vmax.f32 %v386_v45, 0.0 }
  0xc0   : > { %473 = vmatmul.f32.gmra.mxu1 %v416_v46 }
  0xc3   : > { %v388_v47 = vpop.f32.mrf.mxu0 }
  0xc4   : > { %v389_v48 = vadd.f32 %v1097_v31, %v388_v47 }
  0xc6   : > { %v417_v49 = vmax.f32 %v389_v48, 0.0 }
  0xc8   : > { %476 = vmatmul.f32.gmra.mxu1 %v417_v49 }
  0xcb   : > { %v391_v50 = vpop.f32.mrf.mxu0 }
  0xcc   : > { %v392_v51 = vadd.f32 %v1097_v31, %v391_v50 }
  0xce   : > { %v418_v52 = vmax.f32 %v392_v51, 0.0 }
  0xd0   : > { %479 = vmatmul.f32.gmra.mxu1 %v418_v52 }
  0xd3   : > { %v394_v53 = vpop.f32.mrf.mxu0 }
  0xd4   : > { %v395_v54 = vadd.f32 %v1097_v31, %v394_v53 }
  0xd6   : > { %v419_v55 = vmax.f32 %v395_v54, 0.0 }
  0xd8   : > { %482 = vmatmul.f32.gmra.mxu1 %v419_v55 }
  0xdb   : > { %v397_v56 = vpop.f32.mrf.mxu0 }
  0xdc   : > { %v398_v57 = vadd.f32 %v1097_v31, %v397_v56 }
  0xde   : > { %v420_v58 = vmax.f32 %v398_v57, 0.0 }
  0xe0   : > { %485 = vmatmul.f32.gmra.mxu1 %v420_v58 }
  0xe3   : > { %v400_v62 = vpop.f32.mrf.mxu0 }
  0xe4   : > { %v401_v63 = vadd.f32 %v1097_v31, %v400_v62 }
  0xe6   : > { %v421_v1 = vmax.f32 %v401_v63, 0.0  ;;  %v806_v63 = vld [vmem:[%s1176_s6] ss:$0 sm:$0xff] }
  0xe8   : > { %488 = vmatmul.f32.vlgmr.msra.gmra.mxu3 %v421_v1 }
  0xeb   : > { %v403_v5 = vpop.f32.mrf.mxu0 }
  0xec   : > { %v404_v6 = vadd.f32 %v1097_v31, %v403_v5 }
  0xee   : > { %v422_v8 = vmax.f32 %v404_v6, 0.0 }
  0xf0   : > { %491 = vmatmul.f32.gmra.mxu3 %v422_v8 }
  0xf3   : > { %v406_v12 = vpop.f32.mrf.mxu0 }
  0xf4   : > { %v407_v13 = vadd.f32 %v1097_v31, %v406_v12 }
  0xf6   : > { %v423_v15 = vmax.f32 %v407_v13, 0.0 }
  0xf8   : > { %494 = vmatmul.f32.gmra.mxu3 %v423_v15 }
  0xfb   : > { %v409_v17 = vpop.f32.mrf.mxu0 }
  0xfc   : > { %v410_v18 = vadd.f32 %v1097_v31, %v409_v17 }
  0xfe   : > { %v424_v20 = vmax.f32 %v410_v18, 0.0 }
 0x100   : > { %497 = vmatmul.f32.gmra.mxu3 %v424_v20 }
 0x11d   : > { %v462_v24 = vpop.f32.mrf.mxu1 }
 0x11e   : > { %v463_v25 = vadd.f32 %v805_v23, %v462_v24 }
 0x120   : > { %v501_v26 = vmax.f32 %v463_v25, 0.0 }
 0x122   : > { %550 = vmatmul.f32.vlgmr.msra.gmra.mxu2 %v501_v26 }
 0x125   : > { %v465_v27 = vpop.f32.mrf.mxu1 }
 0x126   : > { %v466_v28 = vadd.f32 %v805_v23, %v465_v27 }
 0x128   : > { %v502_v29 = vmax.f32 %v466_v28, 0.0 }
 0x12a   : > { %553 = vmatmul.f32.gmra.mxu2 %v502_v29 }
 0x12d   : > { %v468_v30 = vpop.f32.mrf.mxu1 }
 0x12e   : > { %v469_v31 = vadd.f32 %v805_v23, %v468_v30 }
 0x130   : > { %v503_v32 = vmax.f32 %v469_v31, 0.0 }
 0x132   : > { %556 = vmatmul.f32.gmra.mxu2 %v503_v32 }
 0x135   : > { %v471_v33 = vpop.f32.mrf.mxu1 }
 0x136   : > { %v472_v34 = vadd.f32 %v805_v23, %v471_v33 }
 0x138   : > { %v504_v35 = vmax.f32 %v472_v34, 0.0 }
 0x13a   : > { %559 = vmatmul.f32.gmra.mxu2 %v504_v35 }
 0x13d   : > { %v474_v36 = vpop.f32.mrf.mxu1 }
 0x13e   : > { %v475_v37 = vadd.f32 %v805_v23, %v474_v36 }
 0x140   : > { %v505_v38 = vmax.f32 %v475_v37, 0.0 }
 0x142   : > { %562 = vmatmul.f32.gmra.mxu2 %v505_v38 }
 0x145   : > { %v477_v39 = vpop.f32.mrf.mxu1 }
 0x146   : > { %v478_v40 = vadd.f32 %v805_v23, %v477_v39 }
 0x148   : > { %v506_v41 = vmax.f32 %v478_v40, 0.0 }
 0x14a   : > { %565 = vmatmul.f32.gmra.mxu2 %v506_v41 }
 0x14d   : > { %v480_v42 = vpop.f32.mrf.mxu1 }
 0x14e   : > { %v481_v43 = vadd.f32 %v805_v23, %v480_v42 }
 0x150   : > { %v507_v44 = vmax.f32 %v481_v43, 0.0 }
 0x152   : > { %568 = vmatmul.f32.gmra.mxu2 %v507_v44 }
 0x155   : > { %v483_v45 = vpop.f32.mrf.mxu1 }
 0x156   : > { %v484_v46 = vadd.f32 %v805_v23, %v483_v45 }
 0x158   : > { %v508_v47 = vmax.f32 %v484_v46, 0.0 }
 0x15a   : > { %571 = vmatmul.f32.gmra.mxu2 %v508_v47 }
 0x15d   : > { %v486_v48 = vpop.f32.mrf.mxu1 }
 0x15e   : > { %v487_v49 = vadd.f32 %v805_v23, %v486_v48 }
 0x160   : > { %v509_v50 = vmax.f32 %v487_v49, 0.0 }
 0x162   : > { %574 = vmatmul.f32.gmra.mxu2 %v509_v50 }
 0x16b   : > { %v489_v51 = vpop.f32.mrf.mxu3 }
 0x16c   : > { %v490_v52 = vadd.f32 %v805_v23, %v489_v51 }
 0x16e   : > { %v510_v53 = vmax.f32 %v490_v52, 0.0 }
 0x170   : > { %577 = vmatmul.f32.vlgmr.msrb.gmra.mxu3 %v510_v53 }
 0x173   : > { %v492_v54 = vpop.f32.mrf.mxu3 }
 0x174   : > { %v493_v55 = vadd.f32 %v805_v23, %v492_v54 }
 0x176   : > { %v511_v56 = vmax.f32 %v493_v55, 0.0 }
 0x178   : > { %580 = vmatmul.f32.gmra.mxu3 %v511_v56 }
 0x17b   : > { %v495_v57 = vpop.f32.mrf.mxu3 }
 0x17c   : > { %v496_v58 = vadd.f32 %v805_v23, %v495_v57 }
 0x17e   : > { %v512_v59 = vmax.f32 %v496_v58, 0.0 }
 0x180   : > { %583 = vmatmul.f32.gmra.mxu3 %v512_v59 }
 0x183   : > { %v498_v60 = vpop.f32.mrf.mxu3 }
 0x184   : > { %v499_v61 = vadd.f32 %v805_v23, %v498_v60 }
 0x186   : > { %v513_v62 = vmax.f32 %v499_v61, 0.0 }
 0x188   : > { %586 = vmatmul.f32.gmra.mxu3 %v513_v62 }
 0x1a5   : > { %v551_v0 = vpop.f32.mrf.mxu2 }
 0x1a6   : > { %v552_v1 = vadd.f32 %v806_v63, %v551_v0 }
 0x1a8   : > { %590 = vst [vmem:[%s1121_s15] sm:$0xff] %v552_v1 }
 0x1ad   : > { %v554_v2 = vpop.f32.mrf.mxu2 }
 0x1ae   : > { %v555_v3 = vadd.f32 %v806_v63, %v554_v2 }
 0x1b0   : > { %591 = vst [vmem:[%s1121_s15 + $0x8] sm:$0xff] %v555_v3 }
 0x1b5   : > { %v557_v4 = vpop.f32.mrf.mxu2 }
 0x1b6   : > { %v558_v5 = vadd.f32 %v806_v63, %v557_v4 }
 0x1b8   : > { %592 = vst [vmem:[%s1121_s15 + $0x10] sm:$0xff] %v558_v5 }
 0x1bd   : > { %v560_v6 = vpop.f32.mrf.mxu2 }
 0x1be   : > { %v561_v7 = vadd.f32 %v806_v63, %v560_v6 }
 0x1c0   : > { %593 = vst [vmem:[%s1121_s15 + $0x18] sm:$0xff] %v561_v7 }
 0x1c5   : > { %v563_v8 = vpop.f32.mrf.mxu2 }
 0x1c6   : > { %v564_v9 = vadd.f32 %v806_v63, %v563_v8 }
 0x1c8   : > { %594 = vst [vmem:[%s1121_s15 + $0x20] sm:$0xff] %v564_v9 }
 0x1cd   : > { %v566_v10 = vpop.f32.mrf.mxu2 }
 0x1ce   : > { %v567_v11 = vadd.f32 %v806_v63, %v566_v10 }
 0x1d0   : > { %595 = vst [vmem:[%s1121_s15 + $0x28] sm:$0xff] %v567_v11 }
 0x1d5   : > { %v569_v12 = vpop.f32.mrf.mxu2 }
 0x1d6   : > { %v570_v13 = vadd.f32 %v806_v63, %v569_v12 }
 0x1d8   : > { %596 = vst [vmem:[%s1121_s15 + $0x30] sm:$0xff] %v570_v13 }
 0x1dd   : > { %v572_v14 = vpop.f32.mrf.mxu2 }
 0x1de   : > { %v573_v15 = vadd.f32 %v806_v63, %v572_v14 }
 0x1e0   : > { %597 = vst [vmem:[%s1121_s15 + $0x38] sm:$0xff] %v573_v15 }
 0x1e5   : > { %v575_v16 = vpop.f32.mrf.mxu2 }
 0x1e6   : > { %v576_v17 = vadd.f32 %v806_v63, %v575_v16 }
 0x1e8   : > { %598 = vst [vmem:[%s1121_s15 + $0x40] sm:$0xff] %v576_v17 }
 0x1f3   : > { %v578_v18 = vpop.f32.mrf.mxu3 }
 0x1f4   : > { %v579_v19 = vadd.f32 %v806_v63, %v578_v18 }
 0x1f6   : > { %599 = vst [vmem:[%s1121_s15 + $0x48] sm:$0xff] %v579_v19 }
 0x1fb   : > { %v581_v20 = vpop.f32.mrf.mxu3 }
 0x1fc   : > { %v582_v21 = vadd.f32 %v806_v63, %v581_v20 }
 0x1fe   : > { %600 = vst [vmem:[%s1121_s15 + $0x50] sm:$0xff] %v582_v21 }
 0x203   : > { %v584_v22 = vpop.f32.mrf.mxu3 }
 0x204   : > { %v585_v23 = vadd.f32 %v806_v63, %v584_v22 }
 0x206   : > { %601 = vst [vmem:[%s1121_s15 + $0x58] sm:$0xff] %v585_v23 }
 0x20b   : > { %v587_v24 = vpop.f32.mrf.mxu3 }
 0x20c   : > { %v588_v25 = vadd.f32 %v806_v63, %v587_v24 }
 0x20e   : > { %602 = vst [vmem:[%s1121_s15 + $0x60] sm:$0xff] %v588_v25 }
 0x20f   : > { %864 = shalt.err (!%p861_p8)
}
 0x210   : > { %s908_s29 = smov 128   ;;  %s909_s15 = smov 8  }
 0x211   : > { %754 = dma.vmem_to_hbm [thread:$0]  (%p988_p5), %s617_s20, 1664, %s619_s21, %s604_s22, %s908_s29, %s908_s29, %s909_s15  }
 0x212 PF: > { %p766_p9 = scmp.ge.s32.totalorder %s903_s27, 2  ;;  %s633_s17 = sand.u32 1, %s891_s24  }
 0x213   : > { %s634_s18 = scalar_lea.sflag [#allocation4], %s633_s17 }
 0x214   : > { %p761_p10 = pnand %p766_p9, %p992_p6 }
 0x216   : > { %p762_p11 = pneg %p761_p10 }
 0x218   : > { %886 = dma.done.wait (%p762_p11), %s634_s18, 1664  }
 0x219   : > { %888 = vsyncadd (%p762_p11), %s634_s18, 4294965632  ;;  %p18_p12 = scmp.ge.s32.totalorder %s975_s30, 4   ;;  %s1180_s24 = smov %s895_s25 }
 0x21a   : > { %s1181_s25 = smov %s899_s26  ;;  %s1182_s26 = smov %s986_s10 }
 0x21b   : > { %s1183_s27 = smov %s975_s30  ;;  %20 = sbr.rel (!%p18_p12) target bundleno = 4 (0x4), region = 88 }
 0x220   :  { %640 = vsyncpa [#allocation3], 1 }
 0x221   :  { %642 = vsyncpa [#allocation3 + $0x1], 1 }
 0x222   :  { %643 = vsyncpa [#allocation4], 1 }
 0x223   :  { %645 = vsyncpa [#allocation4 + $0x1], 1 }

</bundles_post_ra>
